<compile_context>
chip_gen: v5e
topology: v5e:2x2
jax: 0.10.0
libtpu: 0.0.40
codegen_flags: <defaults>
</compile_context>

<pallas_src>
import functools
import math

import jax
import jax.numpy as jnp
import numpy as np
from jax import lax
from jax.experimental import pallas as pl
from jax.experimental.pallas import tpu as pltpu

# ----------------------------- config (small, synthetic) -----------------------------
BATCH = 2
SEQ = 8
HIDDEN = 32
NUM_HEADS = 4
HEAD_DIM = HIDDEN // NUM_HEADS
LN_EPS = 1e-12


# ----------------------------- Pallas kernel -----------------------------
def bert_attention_kernel(
    x_ref,      # (bb*S, H)   flattened hidden states for this batch block (f32)
    mask_ref,   # (bb, 1, S)  additive attention mask (f32)
    wqkv_ref,   # (H, 3H)     fused [Wq*scale | Wk | Wv] (y = x @ W), compute_dtype
    bqkv_ref,   # (1, 3H)     f32
    wo_ref,     # (H, H)      output dense, compute_dtype
    bo_ref,     # (1, H)      f32
    gamma_ref,  # (1, H)      LayerNorm scale (f32)
    beta_ref,   # (1, H)      LayerNorm shift (f32)
    out_ref,    # (bb*S, H)   f32
    *, bb, seq, hidden, nheads, dh, compute_dtype,
):
    x = x_ref[...]                                       # (bb*S, H) f32 (kept for residual)
    x_mm = x.astype(compute_dtype)

    # One fused, lane-dense QKV projection over all bb*S rows (single MXU matmul, 3H lanes).
    # 1/sqrt(dh) is already folded into the Q columns/bias (done in the wrapper).
    qkv = (jnp.dot(x_mm, wqkv_ref[...], preferred_element_type=jnp.float32)
           + bqkv_ref[...])                              # (bb*S, 3H) f32

    ctx_parts = []
    for b in range(bb):  # bb is tiny & static (VMEM-budget-capped in the wrapper)
        qkv_b = qkv[b * seq:(b + 1) * seq, :]            # (S, 3H)

        # Single relayout to head-batched form: (S, 3H) -> (3*nheads, S, dh).
        # Column order of w_qkv is [q_h0..q_h{n-1} | k_h0.. | v_h0..], so leading-axis
        # slices below pick q / k / v without any per-head lane extraction.
        t = qkv_b.reshape(seq, 3 * nheads, dh).transpose(1, 0, 2)
        q = t[:nheads]                                   # (nh, S, dh), pre-scaled
        k = t[nheads:2 * nheads]                         # (nh, S, dh)
        v = t[2 * nheads:]                               # (nh, S, dh)

        # All heads in ONE batched matmul (heads on the batch axis, dh contracted).
        scores = jnp.einsum('hqd,hkd->hqk', q, k,
                            preferred_element_type=jnp.float32)      # (nh, S, S)
        scores = scores + mask_ref[b]                    # (1, S) broadcasts over heads/rows

        # Numerically-stable softmax; normalization deferred past the PV matmul.
        m = jnp.max(scores, axis=-1, keepdims=True)
        e = jnp.exp(scores - m)
        denom = jnp.sum(e, axis=-1, keepdims=True)       # (nh, S, 1)

        ctx = jnp.einsum('hqk,hkd->hqd',
                         e.astype(compute_dtype), v.astype(compute_dtype),
                         preferred_element_type=jnp.float32)          # (nh, S, dh)
        # nh*S reciprocals (EUP) instead of nh*S*S divides.
        ctx = ctx * pl.reciprocal(denom, approx=False)

        # Back to (S, H); contexts stay in vregs (no VMEM slab, no masked per-head stores).
        ctx_parts.append(ctx.transpose(1, 0, 2).reshape(seq, hidden))

    context = ctx_parts[0] if bb == 1 else jnp.concatenate(ctx_parts, axis=0)

    # Output dense + residual.
    proj = (jnp.dot(context.astype(compute_dtype), wo_ref[...],
                    preferred_element_type=jnp.float32) + bo_ref[...])
    y = proj + x

    # LayerNorm (TF-style: eps inside sqrt, biased variance); rsqrt goes to the EUP.
    u = jnp.mean(y, axis=-1, keepdims=True)
    d = y - u
    var = jnp.mean(d * d, axis=-1, keepdims=True)
    inv_std = lax.rsqrt(var + LN_EPS)
    out_ref[...] = (gamma_ref[...] * (d * inv_std) + beta_ref[...]).astype(out_ref.dtype)


# ----------------------------- wrapper -----------------------------
def _pick_batch_block(batch, seq, hidden, *, dtype_bytes=4, vmem_budget_bytes=8 << 20):
    """Batch elements per grid step, bounded by a VMEM activation budget and forced to
    give >= 2 grid steps when possible so the BlockSpec pipeline overlaps input DMA,
    compute and output DMA (and both TensorCores get work on dual-TC chips)."""
    # per-element activations: x + qkv (3x) + context + output + slack  ~ 8 * S*H words
    per_elem = seq * hidden * dtype_bytes * 8
    bb = max(1, min(batch, vmem_budget_bytes // max(per_elem, 1)))
    while bb > 1 and (batch // bb) < 2:      # keep at least 2 pipeline steps
        bb -= 1
    while batch % bb:                        # must divide the batch
        bb -= 1
    return max(bb, 1)


def bert_attention(x, attention_mask, params, *, batch_block=None,
                   compute_dtype=jnp.float32):
    """x: (B, S, H) f32; attention_mask: (B, 1, 1, S) additive mask.

    Returns (attention_output, None) — matching BertAttention.forward with
    get_attention_matrices=False. Dropout is identity (inference semantics).
    Set compute_dtype=jnp.bfloat16 on v6e/v7x for MXU-native matmul inputs
    (accumulation stays f32; softmax/LayerNorm stay f32).
    """
    B, S, H = x.shape
    if batch_block is None:
        batch_block = _pick_batch_block(B, S, H)
    assert B % batch_block == 0
    BB = batch_block

    mask = attention_mask.reshape(B, 1, S).astype(jnp.float32)

    # nn.Linear stores weight as (out, in); kernel uses x @ W, so pass W.T.
    inv_sqrt_d = 1.0 / math.sqrt(HEAD_DIM)
    wq = params["wq"].T * inv_sqrt_d         # fold 1/sqrt(dh) into the Q projection
    bq = params["bq"] * inv_sqrt_d
    wk, bk = params["wk"].T, params["bk"]
    wv, bv = params["wv"].T, params["bv"]
    w_qkv = jnp.concatenate([wq, wk, wv], axis=1).astype(compute_dtype)   # (H, 3H)
    b_qkv = jnp.concatenate([bq, bk, bv], axis=0).reshape(1, 3 * H).astype(jnp.float32)
    wo = params["wo"].T.astype(compute_dtype)
    bo = params["bo"].reshape(1, H).astype(jnp.float32)
    gamma = params["ln_gamma"].reshape(1, H).astype(jnp.float32)
    beta = params["ln_beta"].reshape(1, H).astype(jnp.float32)

    xf = x.reshape(B * S, H)

    kernel = functools.partial(
        bert_attention_kernel,
        bb=BB, seq=S, hidden=H, nheads=NUM_HEADS, dh=HEAD_DIM,
        compute_dtype=compute_dtype)

    # Grid-invariant operands: single-buffered (no point double-buffering constants).
    def _invariant(shape):
        return pl.BlockSpec(shape, lambda i: (0,) * len(shape),
                            pipeline_mode=pl.Buffered(1))

    out = pl.pallas_call(
        kernel,
        out_shape=jax.ShapeDtypeStruct((B * S, H), jnp.float32),
        grid_spec=pltpu.PrefetchScalarGridSpec(
            num_scalar_prefetch=0,
            grid=(B // BB,),
            in_specs=[
                pl.BlockSpec((BB * S, H), lambda i: (i, 0)),      # x rows (pipelined)
                pl.BlockSpec((BB, 1, S), lambda i: (i, 0, 0)),    # mask (pipelined)
                _invariant((H, 3 * H)),                           # fused QKV weight
                _invariant((1, 3 * H)),                           # fused QKV bias
                _invariant((H, H)),                               # Wo
                _invariant((1, H)),                               # bo
                _invariant((1, H)),                               # gamma
                _invariant((1, H)),                               # beta
            ],
            out_specs=pl.BlockSpec((BB * S, H), lambda i: (i, 0)),
        ),
        compiler_params=pltpu.CompilerParams(
            dimension_semantics=("parallel",),
            vmem_limit_bytes=32 * 1024 * 1024),
    )(xf, mask, w_qkv, b_qkv, wo, bo, gamma, beta)

    return out.reshape(B, S, H), None   # attention matrices not requested


# ----------------------------- pure-JAX reference -----------------------------
def bert_attention_ref(x, attention_mask, params):
    B, S, H = x.shape
    def lin(t, w, b):
        return jnp.einsum("bsh,oh->bso", t, w) + b
    q = lin(x, params["wq"], params["bq"]).reshape(B, S, NUM_HEADS, HEAD_DIM).transpose(0, 2, 1, 3)
    k = lin(x, params["wk"], params["bk"]).reshape(B, S, NUM_HEADS, HEAD_DIM).transpose(0, 2, 1, 3)
    v = lin(x, params["wv"], params["bv"]).reshape(B, S, NUM_HEADS, HEAD_DIM).transpose(0, 2, 1, 3)
    scores = jnp.einsum("bhqd,bhkd->bhqk", q, k) / math.sqrt(HEAD_DIM)
    scores = scores + attention_mask
    probs = jax.nn.softmax(scores, axis=-1)
    ctx = jnp.einsum("bhqk,bhkd->bhqd", probs, v).transpose(0, 2, 1, 3).reshape(B, S, H)
    proj = lin(ctx, params["wo"], params["bo"])
    y = proj + x
    u = jnp.mean(y, axis=-1, keepdims=True)
    s = jnp.mean((y - u) ** 2, axis=-1, keepdims=True)
    return params["ln_gamma"] * ((y - u) / jnp.sqrt(s + LN_EPS)) + params["ln_beta"]


# ----------------------------- main -----------------------------
if __name__ == "__main__":
    key = jax.random.PRNGKey(0)
    keys = jax.random.split(key, 12)

    bound = 1.0 / math.sqrt(HIDDEN)
    def unif(k, shape):
        return jax.random.uniform(k, shape, jnp.float32, minval=-bound, maxval=bound)

    params = {
        "wq": unif(keys[0], (HIDDEN, HIDDEN)), "bq": unif(keys[1], (HIDDEN,)),
        "wk": unif(keys[2], (HIDDEN, HIDDEN)), "bk": unif(keys[3], (HIDDEN,)),
        "wv": unif(keys[4], (HIDDEN, HIDDEN)), "bv": unif(keys[5], (HIDDEN,)),
        "wo": unif(keys[6], (HIDDEN, HIDDEN)), "bo": unif(keys[7], (HIDDEN,)),
        "ln_gamma": jnp.ones((HIDDEN,), jnp.float32),
        "ln_beta": jnp.zeros((HIDDEN,), jnp.float32),
    }

    x = jax.random.normal(keys[8], (BATCH, SEQ, HIDDEN), jnp.float32)

    # Standard BERT additive mask: last two tokens of batch 1 are masked out.
    valid = jnp.ones((BATCH, SEQ), jnp.float32).at[1, -2:].set(0.0)
    attention_mask = (1.0 - valid)[:, None, None, :] * -10000.0   # (B, 1, 1, S)

    out, attn = bert_attention(x, attention_mask, params)
    out = jax.block_until_ready(out)

    ref = bert_attention_ref(x, attention_mask, params)
    np.testing.assert_allclose(np.asarray(out), np.asarray(ref), rtol=1e-5, atol=1e-5)

    print("KERNEL_OK")
</pallas_src>

<mosaic_0001>
module attributes {stable_mosaic.version = 11 : i64} {
  func.func @bert_attention_kernel(%arg0: i32, %arg1: memref<8x32xf32, #tpu.memory_space<vmem>>, %arg2: memref<1x1x8xf32, #tpu.memory_space<vmem>>, %arg3: memref<32x96xf32, #tpu.memory_space<vmem>>, %arg4: memref<1x96xf32, #tpu.memory_space<vmem>>, %arg5: memref<32x32xf32, #tpu.memory_space<vmem>>, %arg6: memref<1x32xf32, #tpu.memory_space<vmem>>, %arg7: memref<1x32xf32, #tpu.memory_space<vmem>>, %arg8: memref<1x32xf32, #tpu.memory_space<vmem>>, %arg9: memref<8x32xf32, #tpu.memory_space<vmem>>) attributes {dimension_semantics = [#tpu.dimension_semantics<parallel>], iteration_bounds = array<i64: 2>, scalar_prefetch = 0 : i64, scratch_operands = 0 : i64, tpu.core_type = #tpu.core_type<tc>, window_params = [{transform_indices = @transform_0, window_bounds = array<i64: 8, 32>}, {transform_indices = @transform_1, window_bounds = array<i64: 1, 1, 8>}, {pipeline_mode = #tpu.pipeline_mode<synchronous>, transform_indices = @transform_2, window_bounds = array<i64: 32, 96>}, {pipeline_mode = #tpu.pipeline_mode<synchronous>, transform_indices = @transform_3, window_bounds = array<i64: 1, 96>}, {pipeline_mode = #tpu.pipeline_mode<synchronous>, transform_indices = @transform_4, window_bounds = array<i64: 32, 32>}, {pipeline_mode = #tpu.pipeline_mode<synchronous>, transform_indices = @transform_5, window_bounds = array<i64: 1, 32>}, {pipeline_mode = #tpu.pipeline_mode<synchronous>, transform_indices = @transform_6, window_bounds = array<i64: 1, 32>}, {pipeline_mode = #tpu.pipeline_mode<synchronous>, transform_indices = @transform_7, window_bounds = array<i64: 1, 32>}, {transform_indices = @transform_8, window_bounds = array<i64: 8, 32>}]} {
    %c0 = arith.constant 0 : index
    %c0_0 = arith.constant 0 : index
    %0 = vector.load %arg1[%c0, %c0_0] : memref<8x32xf32, #tpu.memory_space<vmem>>, vector<8x32xf32>
    %c0_1 = arith.constant 0 : index
    %c0_2 = arith.constant 0 : index
    %1 = vector.load %arg3[%c0_1, %c0_2] : memref<32x96xf32, #tpu.memory_space<vmem>>, vector<32x96xf32>
    %cst = arith.constant dense<0.000000e+00> : vector<8x96xf32>
    %2 = tpu.matmul %0, %1, %cst {dimension_numbers = #tpu.dot_dimension_numbers<[1], [0], [0], [1], [0, 0, 1, 1], [], []>} : vector<8x32xf32>, vector<32x96xf32>, vector<8x96xf32> -> vector<8x96xf32>
    %c0_3 = arith.constant 0 : index
    %c0_4 = arith.constant 0 : index
    %3 = vector.load %arg4[%c0_3, %c0_4] : memref<1x96xf32, #tpu.memory_space<vmem>>, vector<1x96xf32>
    %4 = vector.broadcast %3 : vector<1x96xf32> to vector<8x96xf32>
    %5 = arith.addf %2, %4 : vector<8x96xf32>
    %6 = vector.shape_cast %5 : vector<8x96xf32> to vector<8x12x8xf32>
    %7 = tpu.transpose %6, [1, 0, 2] : vector<8x12x8xf32> -> vector<12x8x8xf32>
    %8 = vector.extract_strided_slice %7 {offsets = [0, 0, 0], sizes = [4, 8, 8], strides = [1, 1, 1]} : vector<12x8x8xf32> to vector<4x8x8xf32>
    %9 = vector.extract_strided_slice %7 {offsets = [4, 0, 0], sizes = [4, 8, 8], strides = [1, 1, 1]} : vector<12x8x8xf32> to vector<4x8x8xf32>
    %10 = vector.extract_strided_slice %7 {offsets = [8, 0, 0], sizes = [4, 8, 8], strides = [1, 1, 1]} : vector<12x8x8xf32> to vector<4x8x8xf32>
    "tpu.trace_start"() <{level = 10 : i32, message = "hqd,hkd->hqk"}> : () -> ()
    %cst_5 = arith.constant dense<0.000000e+00> : vector<4x8x8xf32>
    %11 = tpu.matmul %8, %9, %cst_5 {dimension_numbers = #tpu.dot_dimension_numbers<[2], [2], [1], [1], [0, 0, 0, 1, 1, 1], [0], [0]>} : vector<4x8x8xf32>, vector<4x8x8xf32>, vector<4x8x8xf32> -> vector<4x8x8xf32>
    "tpu.trace_stop"() : () -> ()
    %c0_6 = arith.constant 0 : index
    %c0_7 = arith.constant 0 : index
    %c0_8 = arith.constant 0 : index
    %12 = vector.load %arg2[%c0_6, %c0_7, %c0_8] : memref<1x1x8xf32, #tpu.memory_space<vmem>>, vector<1x1x8xf32>
    %13 = vector.shape_cast %12 : vector<1x1x8xf32> to vector<1x8xf32>
    %14 = vector.shape_cast %13 : vector<1x8xf32> to vector<1x1x8xf32>
    %15 = vector.broadcast %14 : vector<1x1x8xf32> to vector<4x8x8xf32>
    %16 = arith.addf %11, %15 : vector<4x8x8xf32>
    %cst_9 = arith.constant dense<0xFF800000> : vector<4x8xf32>
    %17 = vector.multi_reduction <maximumf>, %16, %cst_9 [2] : vector<4x8x8xf32> to vector<4x8xf32>
    %18 = vector.shape_cast %17 : vector<4x8xf32> to vector<4x8x1xf32>
    %19 = vector.broadcast %18 : vector<4x8x1xf32> to vector<4x8x8xf32>
    %20 = arith.subf %16, %19 : vector<4x8x8xf32>
    %21 = math.exp %20 : vector<4x8x8xf32>
    %cst_10 = arith.constant dense<0.000000e+00> : vector<4x8xf32>
    %22 = vector.multi_reduction <add>, %21, %cst_10 [2] : vector<4x8x8xf32> to vector<4x8xf32>
    %23 = vector.shape_cast %22 : vector<4x8xf32> to vector<4x8x1xf32>
    "tpu.trace_start"() <{level = 10 : i32, message = "hqk,hkd->hqd"}> : () -> ()
    %cst_11 = arith.constant dense<0.000000e+00> : vector<4x8x8xf32>
    %24 = tpu.matmul %21, %10, %cst_11 {dimension_numbers = #tpu.dot_dimension_numbers<[2], [1], [1], [2], [0, 0, 0, 1, 1, 2], [0], [0]>} : vector<4x8x8xf32>, vector<4x8x8xf32>, vector<4x8x8xf32> -> vector<4x8x8xf32>
    "tpu.trace_stop"() : () -> ()
    %25 = tpu.reciprocal %23 : vector<4x8x1xf32> -> vector<4x8x1xf32>
    %26 = vector.broadcast %25 : vector<4x8x1xf32> to vector<4x8x8xf32>
    %27 = arith.mulf %24, %26 : vector<4x8x8xf32>
    %28 = tpu.transpose %27, [1, 0, 2] : vector<4x8x8xf32> -> vector<8x4x8xf32>
    %29 = vector.shape_cast %28 : vector<8x4x8xf32> to vector<8x32xf32>
    %c0_12 = arith.constant 0 : index
    %c0_13 = arith.constant 0 : index
    %30 = vector.load %arg5[%c0_12, %c0_13] : memref<32x32xf32, #tpu.memory_space<vmem>>, vector<32x32xf32>
    %cst_14 = arith.constant dense<0.000000e+00> : vector<8x32xf32>
    %31 = tpu.matmul %29, %30, %cst_14 {dimension_numbers = #tpu.dot_dimension_numbers<[1], [0], [0], [1], [0, 0, 1, 1], [], []>} : vector<8x32xf32>, vector<32x32xf32>, vector<8x32xf32> -> vector<8x32xf32>
    %c0_15 = arith.constant 0 : index
    %c0_16 = arith.constant 0 : index
    %32 = vector.load %arg6[%c0_15, %c0_16] : memref<1x32xf32, #tpu.memory_space<vmem>>, vector<1x32xf32>
    %33 = vector.broadcast %32 : vector<1x32xf32> to vector<8x32xf32>
    %34 = arith.addf %31, %33 : vector<8x32xf32>
    %35 = arith.addf %34, %0 : vector<8x32xf32>
    %cst_17 = arith.constant dense<0.000000e+00> : vector<8xf32>
    %36 = vector.multi_reduction <add>, %35, %cst_17 [1] : vector<8x32xf32> to vector<8xf32>
    %37 = vector.shape_cast %36 : vector<8xf32> to vector<8x1xf32>
    %cst_18 = arith.constant 3.200000e+01 : f32
    %38 = vector.broadcast %cst_18 : f32 to vector<8x1xf32>
    %39 = arith.divf %37, %38 : vector<8x1xf32>
    %40 = vector.broadcast %39 : vector<8x1xf32> to vector<8x32xf32>
    %41 = arith.subf %35, %40 : vector<8x32xf32>
    %42 = arith.mulf %41, %41 : vector<8x32xf32>
    %cst_19 = arith.constant dense<0.000000e+00> : vector<8xf32>
    %43 = vector.multi_reduction <add>, %42, %cst_19 [1] : vector<8x32xf32> to vector<8xf32>
    %44 = vector.shape_cast %43 : vector<8xf32> to vector<8x1xf32>
    %cst_20 = arith.constant 3.200000e+01 : f32
    %45 = vector.broadcast %cst_20 : f32 to vector<8x1xf32>
    %46 = arith.divf %44, %45 : vector<8x1xf32>
    %cst_21 = arith.constant 9.99999996E-13 : f32
    %47 = vector.broadcast %cst_21 : f32 to vector<8x1xf32>
    %48 = arith.addf %46, %47 : vector<8x1xf32>
    %49 = math.rsqrt %48 : vector<8x1xf32>
    %c0_22 = arith.constant 0 : index
    %c0_23 = arith.constant 0 : index
    %50 = vector.load %arg7[%c0_22, %c0_23] : memref<1x32xf32, #tpu.memory_space<vmem>>, vector<1x32xf32>
    %51 = vector.broadcast %49 : vector<8x1xf32> to vector<8x32xf32>
    %52 = arith.mulf %41, %51 : vector<8x32xf32>
    %53 = vector.broadcast %50 : vector<1x32xf32> to vector<8x32xf32>
    %54 = arith.mulf %53, %52 : vector<8x32xf32>
    %c0_24 = arith.constant 0 : index
    %c0_25 = arith.constant 0 : index
    %55 = vector.load %arg8[%c0_24, %c0_25] : memref<1x32xf32, #tpu.memory_space<vmem>>, vector<1x32xf32>
    %56 = vector.broadcast %55 : vector<1x32xf32> to vector<8x32xf32>
    %57 = arith.addf %54, %56 : vector<8x32xf32>
    %c0_26 = arith.constant 0 : index
    %c0_27 = arith.constant 0 : index
    %58 = vector.load %arg9[%c0_26, %c0_27] : memref<8x32xf32, #tpu.memory_space<vmem>>, vector<8x32xf32>
    tpu.vector_store %arg9[%c0_26, %c0_27], %57 {strides = array<i32>} : memref<8x32xf32, #tpu.memory_space<vmem>>, vector<8x32xf32>,
    return
  }
  func.func @transform_0(%arg0: i32) -> (i32, i32) {
    %c0_i32 = arith.constant 0 : i32
    %c0_i32_0 = arith.constant 0 : i32
    return %arg0, %c0_i32 : i32, i32
  }
  func.func @transform_1(%arg0: i32) -> (i32, i32, i32) {
    %c0_i32 = arith.constant 0 : i32
    %c0_i32_0 = arith.constant 0 : i32
    %c0_i32_1 = arith.constant 0 : i32
    return %arg0, %c0_i32, %c0_i32_0 : i32, i32, i32
  }
  func.func @transform_2(%arg0: i32) -> (i32, i32) {
    %c0_i32 = arith.constant 0 : i32
    %c0_i32_0 = arith.constant 0 : i32
    %c0_i32_1 = arith.constant 0 : i32
    return %c0_i32, %c0_i32_0 : i32, i32
  }
  func.func @transform_3(%arg0: i32) -> (i32, i32) {
    %c0_i32 = arith.constant 0 : i32
    %c0_i32_0 = arith.constant 0 : i32
    %c0_i32_1 = arith.constant 0 : i32
    return %c0_i32, %c0_i32_0 : i32, i32
  }
  func.func @transform_4(%arg0: i32) -> (i32, i32) {
    %c0_i32 = arith.constant 0 : i32
    %c0_i32_0 = arith.constant 0 : i32
    %c0_i32_1 = arith.constant 0 : i32
    return %c0_i32, %c0_i32_0 : i32, i32
  }
  func.func @transform_5(%arg0: i32) -> (i32, i32) {
    %c0_i32 = arith.constant 0 : i32
    %c0_i32_0 = arith.constant 0 : i32
    %c0_i32_1 = arith.constant 0 : i32
    return %c0_i32, %c0_i32_0 : i32, i32
  }
  func.func @transform_6(%arg0: i32) -> (i32, i32) {
    %c0_i32 = arith.constant 0 : i32
    %c0_i32_0 = arith.constant 0 : i32
    %c0_i32_1 = arith.constant 0 : i32
    return %c0_i32, %c0_i32_0 : i32, i32
  }
  func.func @transform_7(%arg0: i32) -> (i32, i32) {
    %c0_i32 = arith.constant 0 : i32
    %c0_i32_0 = arith.constant 0 : i32
    %c0_i32_1 = arith.constant 0 : i32
    return %c0_i32, %c0_i32_0 : i32, i32
  }
  func.func @transform_8(%arg0: i32) -> (i32, i32) {
    %c0_i32 = arith.constant 0 : i32
    %c0_i32_0 = arith.constant 0 : i32
    return %arg0, %c0_i32 : i32, i32
  }
}

</mosaic_0001>

<bundles_post_ra>
// kernel: tpu_custom_call.1
= control target key start
LH: loop header
LB: loop body
LE: loop exit
PB: predicated region body
PF: predicated region fallthrough
CT: control target
= control target key end

     0   :  { %s2240_s0 = inlined_call_operand.hbm [shape: f32[16,32], index: 0, kind: input, shape index: {}]   ;;  %s2241_s1 = inlined_call_operand.hbm [shape: f32[2,1,8], index: 1, kind: input, shape index: {}]   ;;  %s2242_s2 = inlined_call_operand.hbm [shape: f32[32,96], index: 2, kind: input, shape index: {}]   ;;  %s2243_s3 = inlined_call_operand.vmem [shape: f32[1,96], index: 3, kind: input, shape index: {}]   ;;  %s2244_s4 = inlined_call_operand.hbm [shape: f32[32,32], index: 4, kind: input, shape index: {}]   ;;  %s2245_s5 = inlined_call_operand.vmem [shape: f32[1,32], index: 5, kind: input, shape index: {}]   ;;  %s2246_s6 = inlined_call_operand.vmem [shape: f32[1,32], index: 6, kind: input, shape index: {}]   ;;  %s2247_s7 = inlined_call_operand.vmem [shape: f32[1,32], index: 7, kind: input, shape index: {}]   ;;  %s2248_s8 = inlined_call_operand.hbm [shape: f32[16,32], index: 8, kind: output, shape index: {}]  }
   0x1   :  { %2253 = sst [smem:[#allocation20_spill]] %s2242_s2 }
   0x2   :  { %2254 = sst [smem:[#allocation21_spill]] %s2244_s4 }
   0x3   :  { %13 = vsyncpa [#allocation3], 0 }
   0x4   :  { %15 = vsyncpa [#allocation3 + $0x1], 0 }
   0x5   :  { %16 = vsyncpa [#allocation6], 0 }
   0x6   :  { %18 = vsyncpa [#allocation6 + $0x1], 0 }
   0x7   :  { %19 = vsyncpa [#allocation9], 0 }
   0x8   :  { %20 = vsyncpa [#allocation4], 0 }
   0x9   :  { %22 = vsyncpa [#allocation4 + $0x1], 0  ;;  %s1825_s27 = smov 0   ;;  %s1827_s28 = smov 0  }
   0xa   :  { %s1829_s29 = smov 0   ;;  %s1831_s30 = smov 0  }
   0xb LB: > { %2255 = sst [smem:[#allocation16_spill]] %s1753_s29  ;;  %s1849_s12 = sadd.s32 4294967295, %s1757_s30   ;;  %s1757_s30 = sphi %s1831_s30, %s2271_s30   ;;  %s1753_s29 = sphi %s1829_s29, %s2273_s29   ;;  %s1749_s28 = sphi %s1827_s28, %s2275_s28   ;;  %s1745_s27 = sphi %s1825_s27, %s2274_s27  }
   0xc   : > { %s2256_s2 = sld [smem:[#allocation20_spill]]  ;;  %p1414_p0 = scmp.ge.s32.totalorder %s1757_s30, 1 }
   0xd   : > { %p49_p1 = scmp.eq.s32.totalorder %s1849_s12, 0  ;;  %p237_p2 = scmp.lt.s32.totalorder %s1757_s30, 3 }
   0xe   : > { %s1759_s14 = smov [#allocation7]   ;;  %s2258_s4 = sld [smem:[#allocation21_spill]] }
   0xf   : > { %p1854_p3 = pnand %p1414_p0, %p237_p2  ;;  %s250_s15 = sshll.u32 %s1759_s14, 4  ;;  %s251_s15 = int_to_ptr.vmem [resolvable:$true] %s250_s15 }
  0x10   : > { %s1760_s19 = smov [#allocation8]   ;;  %s1761_s21 = smov 128  }
  0x11   : > { %p1457_p4 = pneg %p1854_p3  ;;  %s267_s20 = sshll.u32 %s1760_s19, 4  ;;  %s268_s20 = int_to_ptr.vmem [resolvable:$true] %s267_s20 }
  0x12   : > { %s248_s11 = sshll.u32 %s2256_s2, 4  ;;  %s1762_s22 = smov 8   ;;  %s249_s11 = int_to_ptr.hbm [resolvable:$true] %s248_s11 }
  0x13   : > { %p1458_p6 = pnand %p1457_p4, %p49_p1  ;;  %s1413_s23 = sadd.s32 4294967294, %s1757_s30  }
  0x14   : > { %s265_s18 = sshll.u32 %s2258_s4, 4  ;;  %s1868_s24 = sadd.s32 1, %s1757_s30   ;;  %s266_s18 = int_to_ptr.hbm [resolvable:$true] %s265_s18 }
  0x15   : > { %1460 = dma.hbm_to_vmem [thread:$0]  (!%p1458_p6), %s249_s11, 512, %s251_s15, [#allocation6], %s1761_s21, %s1761_s21, %s1762_s22  }
  0x16   : > { %1463 = dma.hbm_to_vmem [thread:$0]  (!%p1458_p6), %s266_s18, 512, %s268_s20, [#allocation9], %s1761_s21, %s1761_s21, %s1762_s22  }
  0x17   : > { %2259 = sst [smem:[#allocation17_spill]] %s1868_s24  ;;  %s32_s25 = ssub.s32 %s1757_s30, %s1868_s24 }
  0x18   : > { %s35_s26 = sadd.s32 1, %s1753_s29  ;;  %p33_p7 = scmp.eq.s32.totalorder %s32_s25, 0 }
  0x19   : > { %p42_p8 = scmp.ne.s32.totalorder %s1753_s29, %s1749_s28  ;;  %p43_p9 = scmp.eq.s32.totalorder %s1757_s30, 0 }
  0x1a   : > { %p48_p10 = scmp.ne.s32.totalorder %s1749_s28, %s1745_s27  ;;  %p224_p13 = scmp.eq.s32.totalorder %s1849_s12, 1 }
  0x1b   : > { %s1879_s9 = scalar_select %p33_p7, %s1753_s29, %s35_s26  }
  0x1c   : > { %p1881_p11 = por %p43_p9, %p42_p8  ;;  %p1887_p12 = por %p49_p1, %p48_p10 }
  0x1d   : > { %2260 = sst [smem:[#allocation18_spill]] %s1879_s9  ;;  %p230_p0 = scmp.eq.s32.totalorder %s1413_s23, 1 }
  0x1e   : > { %p1477_p2 = scmp.lt.s32.totalorder %s1757_s30, 2  ;;  %s1894_s14 = sand.u32 1, %s1753_s29  }
  0x1f   : > { %p1896_p4 = por %p224_p13, %p42_p8  ;;  %p1900_p6 = por %p230_p0, %p48_p10 }
  0x20   : > { %s1418_s17 = sshll.u32 %s1894_s14, 3  ;;  %s1419_s18 = sshll.u32 %s1757_s30, 3 }
  0x21   : > { %s2264_s16 = scalar_select %p1900_p6, 1, 0 }
  0x22   : > { %s298_s21 = scalar_lea.hbm %s2240_s0, %s1419_s18  ;;  %s294_s22 = scalar_lea.vmem [#allocation2], %s1418_s17 }
  0x23   : > { %2265 = sst [smem:[#allocation19_spill]] %s2264_s16  ;;  %s302_s23 = sshll.u32 %s294_s22, 4  ;;  %s303_s23 = int_to_ptr.vmem [resolvable:$true] %s302_s23 }
  0x24   : > { %s300_s25 = sshll.u32 %s298_s21, 4  ;;  %p1911_p7 = pnand %p1477_p2, %p1881_p11  ;;  %s301_s25 = int_to_ptr.hbm [resolvable:$true] %s300_s25 }
  0x25   : > { %s309_s2 = sand.u32 1, %s1757_s30   ;;  %s291_s4 = scalar_lea.sflag [#allocation3], %s1894_s14 }
  0x26   : > { %s1619_s9 = sshra.s32 %s301_s25, 4  ;;  %p1623_p9 = pneg %p1911_p7  ;;  %s1620_s9 = int_to_ptr.hbm [resolvable:$true] %s1619_s9 }
  0x27   : > { %s1621_s29 = scalar_lea.hbm %s1620_s9, 8  ;;  %s1626_s18 = scalar_lea.hbm %s2240_s0, 16 }
  0x28   : > { %p1622_p8 = scmp.ne.s32.totalorder %s1620_s9, %s1621_s29  ;;  %p1627_p11 = scmp.lt.s32.totalorder %s1620_s9, %s2240_s0 }
  0x29   : > { %p1628_p0 = scmp.lt.s32.totalorder %s1626_s18, %s1621_s29 }
  0x2a   : > { %p1624_p10 = pnand %p1623_p9, %p1622_p8 }
  0x2b   : > { %p1629_p2 = por %p1628_p0, %p1627_p11 }
  0x2c   : > { %p1625_p13 = pneg %p1624_p10 }
  0x2e   : > { %p1630_p5 = pnand %p1629_p2, %p1625_p13 }
  0x30   : > { %1633 = shalt.err (!%p1630_p5)
}
  0x31   : > { %1467 = dma.hbm_to_vmem [thread:$0]  (!%p1911_p7), %s301_s25, 128, %s303_s23, %s291_s4  }
  0x32   : > { %s315_s24 = scalar_lea.hbm %s2241_s1, %s1757_s30  ;;  %s312_s17 = scalar_lea.vmem [#allocation5], %s1894_s14 }
  0x33   : > { %s319_s10 = sshll.u32 %s312_s17, 4  ;;  %s317_s16 = sshll.u32 %s315_s24, 4  ;;  %s320_s10 = int_to_ptr.vmem [resolvable:$true] %s319_s10  ;;  %s318_s16 = int_to_ptr.hbm [resolvable:$true] %s317_s16 }
  0x34   : > { %s310_s9 = scalar_lea.sflag [#allocation6], %s309_s2  ;;  %s1649_s29 = sshra.s32 %s318_s16, 4  ;;  %s1650_s29 = int_to_ptr.hbm [resolvable:$true] %s1649_s29 }
  0x35   : > { %s1651_s18 = scalar_lea.hbm %s1650_s29, 1  ;;  %s1656_s23 = scalar_lea.hbm %s2241_s1, 2 }
  0x36   : > { %p1652_p5 = scmp.ne.s32.totalorder %s1650_s29, %s1651_s18  ;;  %p1657_p13 = scmp.lt.s32.totalorder %s1650_s29, %s2241_s1 }
  0x37   : > { %p1658_p11 = scmp.lt.s32.totalorder %s1656_s23, %s1651_s18 }
  0x38   : > { %p1654_p8 = pnand %p1652_p5, %p1623_p9 }
  0x39   : > { %p1659_p0 = por %p1658_p11, %p1657_p13 }
  0x3a   : > { %p1655_p10 = pneg %p1654_p8 }
  0x3c   : > { %p1660_p2 = pnand %p1659_p0, %p1655_p10 }
  0x3e   : > { %1663 = shalt.err (!%p1660_p2)
}
  0x3f   : > { %1470 = dma.hbm_to_vmem [thread:$0]  (!%p1911_p7), %s318_s16, 16, %s320_s10, %s310_s9  }
  0x40   : > { %328 = sbr.rel (%p1854_p3) target bundleno = 1334 (0x536), region = 52  ;;  %s1949_s2 = sand.u32 (!%p1854_p3), 1, %s1749_s28  }
  0x41   : > { %s1421_s24 = sshll.u32 (!%p1854_p3), %s1949_s2, 3  ;;  %s331_s14 = scalar_lea.sflag (!%p1854_p3), [#allocation3], %s1949_s2 }
  0x42   : > { %s334_s21 = scalar_lea.vmem (!%p1854_p3), [#allocation2], %s1421_s24 }
  0x45   : > { %1724 = dma.done.wait (%p1887_p12), %s331_s14, 128  }
  0x46   : > { %1726 = vsyncadd (%p1887_p12), %s331_s14, 4294967168  ;;  %s340_s13 = sand.u32 1, %s1849_s12   ;;  %s343_s26 = scalar_lea.vmem [#allocation5], %s1949_s2 }
  0x47   : > { %s341_s16 = scalar_lea.sflag [#allocation6], %s340_s13 }
  0x48   : > { %1728 = dma.done.wait (%p1887_p12), %s341_s16, 16  }
  0x49   : > { %1730 = vsyncadd (%p1887_p12), %s341_s16, 4294967280 }
  0x4a   : > { %1732 = dma.done.wait (%p49_p1), [#allocation6], 512  }
  0x4b   : > { %1734 = vsyncadd (%p49_p1), [#allocation6], 4294966784 }
  0x4c   : > { %1736 = dma.done.wait (%p49_p1), [#allocation9], 512  }
  0x4d   : > { %1738 = vsyncadd (%p49_p1), [#allocation9], 4294966784  ;;  %v395_v0 = vld [vmem:[#allocation7 + $0x18] sm:$0xff]  ;;  %v394_v1 = vld [vmem:[#allocation7 + $0x10] sm:$0xff]  ;;  %vm400_vm0 = vcmask 261120   ;;  %s1763_s17 = smov 72  }
  0x4e   : > { %416 = vmatpush.msra.mxu0 %v395_v0  ;;  %v393_v2 = vld [vmem:[#allocation7 + $0x8] sm:$0xff]  ;;  %v392_v3 = vld [vmem:[#allocation7] sm:$0xff]  ;;  %s1764_s10 = smov 112   ;;  %s1765_s9 = smov 104   ;;  %v1774_v12 = vmov 1983009808  }
  0x4f   : > { %v1973_v4 = vld [vmem:[%s334_s21] sm:$0xff]  ;;  %s1766_s29 = smov 96   ;;  %s1767_s18 = smov 88   ;;  %v464_v13 = vunpack.c.l.s4 %v1774_v12  ;;  %vm459_vm1 = vcmask 1047556   ;;  %v1775_v24 = vmov 1934713408  }
  0x50   : > { %417 = vmatpush.msra.mxu0 %v394_v1  ;;  %v1534_v5 = vld [vmem:[%s2243_s3] ss:$0 sm:$0xff]  ;;  %s1768_s19 = smov 120   ;;  %s1769_s4 = smov 56   ;;  %v512_v25 = vunpack.c.l.s4 %v1775_v24  ;;  %vm797_vm2 = vcmask 64512  }
  0x51   : > { %s1770_s23 = smov 64   ;;  %s1771_s25 = smov 80   ;;  %v1981_v16 = vunpack.c.0.s8 %v464_v13 }
  0x52   : > { %418 = vmatpush.msra.mxu0 %v393_v2  ;;  %s1772_s20 = smov 40   ;;  %s1773_s14 = smov 48   ;;  %v1992_v37 = vunpack.c.0.s8 %v512_v25 }
  0x53   : > { %s1776_s21 = smov 24   ;;  %s1777_s13 = smov 16  }
  0x54   : > { %419 = vmatpush.msra.mxu0 %v392_v3  ;;  %s1778_s16 = smov 8   ;;  %s1440_s22 = sshll.u32 %s1849_s12, 3 }
  0x55   : > { %1425 = vmatmul.msk.f32.vlgmr.msra.gmra.mxu0 %vm400_vm0, %v1973_v4  ;;  %s390_s12 = scalar_lea.vmem [#allocation10], %s1421_s24  ;;  %s1699_s24 = scalar_lea.hbm %s2248_s8, 16 }
  0xd2   : > { %v421_v6 = vpop.f32.mrf.mxu0 }
  0xd3   : > { %v422_v7 = vadd.f32 %v1534_v5, %v421_v6 }
  0xd5   : > { %443 = vrot.lane.b32.xlu2 %v422_v7, %s1763_s17  ;;  %428 = vrot.lane.b32.xlu1 %v422_v7, %s1764_s10  ;;  %v461_v15 = vrot.slane %v422_v7, 4 }
  0xd6   : > { %431 = vrot.lane.b32.xlu0 %v422_v7, %s1765_s9 }
  0xdd   : > { %434 = vrot.lane.b32.xlu2 %v422_v7, %s1766_s29  ;;  %437 = vrot.lane.b32.xlu1 %v422_v7, %s1767_s18  ;;  %s1300_s18 = scalar_lea.hbm %s2248_s8, %s1440_s22 }
  0xde   : > { %425 = vrot.lane.b32.xlu0 %v422_v7, %s1768_s19 }
  0xe5   : > { %449 = vrot.lane.b32.xlu2 %v422_v7, %s1769_s4  ;;  %446 = vrot.lane.b32.xlu1 %v422_v7, %s1770_s23  ;;  %s1302_s23 = sshll.u32 %s390_s12, 4  ;;  %s1303_s23 = int_to_ptr.vmem [resolvable:$true] %s1302_s23 }
  0xe6   : > { %440 = vrot.lane.b32.xlu0 %v422_v7, %s1771_s25  ;;  %s1304_s25 = sshll.u32 %s1300_s18, 4  ;;  %s1305_s25 = int_to_ptr.hbm [resolvable:$true] %s1304_s25 }
  0xed   : > { %455 = vrot.lane.b32.xlu1 %v422_v7, %s1772_s20  ;;  %s1290_s20 = scalar_lea.sflag [#allocation4], %s1949_s2 }
  0xee   : > { %452 = vrot.lane.b32.xlu0 %v422_v7, %s1773_s14  ;;  %s1693_s14 = sshra.s32 %s1305_s25, 4  ;;  %s1694_s14 = int_to_ptr.hbm [resolvable:$true] %s1693_s14 }
  0xef   : > { %p1700_p7 = scmp.lt.s32.totalorder %s1694_s14, %s2248_s8 }
 0x12f   : > { %v444_v8 = vpop.permute.xlu2 %443 }
 0x130   : > { %v495_v30 = vrot.slane %v444_v8, 4 }
 0x137   : > { %v435_v20 = vpop.permute.xlu2 %434 }
 0x138   : > { %v485_v42 = vrot.slane %v435_v20, 4 }
 0x13f   : > { %v450_v51 = vpop.permute.xlu2 %449 }
 0x140   : > { %v585_v61 = vrot.slane %v450_v51, 4 }
 0x147   : > { %v429_v9 = vpop.permute.xlu1 %428 }
 0x148   : > { %v432_v10 = vpop.permute.xlu0 %431  ;;  %v458_v11 = vrot.slane %v429_v9, 4  ;;  %v462_v17 = vsel %vm459_vm1, %v429_v9, %v461_v15 }
 0x149   : > { %v471_v18 = vrot.slane %v432_v10, 4  ;;  %v470_v28 = vperm.slane %v462_v17, %v1981_v16 }
 0x14a   : > { %v460_v14 = vsel %vm459_vm1, %v458_v11, %v422_v7 }
 0x14b   : > { %v466_v21 = vperm.slane %v460_v14, %v1981_v16  ;;  %v521_v38 = vrot.slane %v470_v28, 4 }
 0x14d   : > { %v509_v33 = vrot.slane %v466_v21, 4 }
 0x14f   : > { %v438_v19 = vpop.permute.xlu1 %437 }
 0x150   : > { %v497_v22 = vrot.slane %v438_v19, 4  ;;  %v426_v23 = vpop.permute.xlu0 %425  ;;  %v496_v36 = vsel %vm459_vm1, %v495_v30, %v438_v19 }
 0x151   : > { %v472_v26 = vsel %vm459_vm1, %v471_v18, %v426_v23  ;;  %v473_v27 = vrot.slane %v426_v23, 4  ;;  %v502_v44 = vperm.slane %v496_v36, %v1981_v16 }
 0x152   : > { %v478_v29 = vperm.slane %v472_v26, %v1981_v16  ;;  %v498_v31 = vsel %vm459_vm1, %v444_v8, %v497_v22 }
 0x153   : > { %v474_v32 = vsel %vm459_vm1, %v432_v10, %v473_v27  ;;  %v506_v39 = vperm.slane %v498_v31, %v1981_v16  ;;  %v531_v59 = vrot.slane %v502_v44, 4 }
 0x154   : > { %v482_v34 = vperm.slane %v474_v32, %v1981_v16  ;;  %v507_v35 = vrot.slane %v478_v29, 4  ;;  %v510_v40 = vsel %vm459_vm1, %v478_v29, %v509_v33 }
 0x155   : > { %v518_v49 = vperm.slane %v510_v40, %v1992_v37  ;;  %v543_v52 = vrot.slane %v506_v39, 4 }
 0x156   : > { %v519_v41 = vrot.slane %v482_v34, 4  ;;  %v508_v45 = vsel %vm459_vm1, %v507_v35, %v466_v21  ;;  %v522_v47 = vsel %vm459_vm1, %v482_v34, %v521_v38 }
 0x157   : > { %v447_v43 = vpop.permute.xlu1 %446  ;;  %v514_v55 = vperm.slane %v508_v45, %v1992_v37  ;;  %v530_v56 = vperm.slane %v522_v47, %v1992_v37  ;;  %v561_v62 = vrot.slane %v518_v49, 4 }
 0x158   : > { %v520_v46 = vsel %vm459_vm1, %v519_v41, %v470_v28  ;;  %v441_v48 = vpop.permute.xlu0 %440  ;;  %v573_v15 = vrot.slane %v447_v43, 4 }
 0x159   : > { %v483_v50 = vrot.slane %v441_v48, 4  ;;  %v526_v53 = vperm.slane %v520_v46, %v1992_v37  ;;  %v486_v54 = vsel %vm459_vm1, %v441_v48, %v485_v42  ;;  %v557_v6 = vrot.slane %v514_v55, 4 }
 0x15a   : > { %v494_v58 = vperm.slane %v486_v54, %v1981_v16  ;;  %v569_v7 = vrot.slane %v530_v56, 4 }
 0x15b   : > { %v484_v57 = vsel %vm459_vm1, %v483_v50, %v435_v20  ;;  %v565_v1 = vrot.slane %v526_v53, 4 }
 0x15c   : > { %v490_v60 = vperm.slane %v484_v57, %v1981_v16  ;;  %v544_v63 = vsel %vm459_vm1, %v543_v52, %v494_v58  ;;  %v545_v0 = vrot.slane %v494_v58, 4 }
 0x15d   : > { %v550_v5 = vperm.slane %v544_v63, %v1992_v37 }
 0x15e   : > { %v532_v2 = vsel %vm459_vm1, %v531_v59, %v490_v60  ;;  %v533_v3 = vrot.slane %v490_v60, 4  ;;  %v546_v9 = vsel %vm459_vm1, %v506_v39, %v545_v0 }
 0x15f   : > { %v538_v8 = vperm.slane %v532_v2, %v1992_v37  ;;  %v456_v10 = vpop.permute.xlu1 %455  ;;  %v554_v12 = vperm.slane %v546_v9, %v1992_v37  ;;  %v563_v13 = vrot.slane %v550_v5, 4  ;;  %v566_v14 = vsel %vm459_vm1, %v550_v5, %v565_v1 }
 0x160   : > { %v534_v11 = vsel %vm459_vm1, %v502_v44, %v533_v3  ;;  %v453_v20 = vpop.permute.xlu0 %452  ;;  %v665_v23 = vrot.slane %v566_v14, 4  ;;  %v583_v24 = vrot.slane %v456_v10, 4  ;;  %v586_v28 = vsel %vm459_vm1, %v456_v10, %v585_v61 }
 0x161   : > { %v542_v17 = vperm.slane %v534_v11, %v1992_v37  ;;  %v555_v18 = vrot.slane %v538_v8, 4  ;;  %v2018_v19 = vsel %vm459_vm1, %v538_v8, %v557_v6  ;;  %v2021_v21 = vsel %vm459_vm1, %v563_v13, %v526_v53 }
 0x162   : > { %v570_v22 = vsel %vm459_vm1, %v554_v12, %v569_v7  ;;  %v567_v26 = vrot.slane %v554_v12, 4  ;;  %v584_v29 = vsel %vm459_vm1, %v583_v24, %v450_v51  ;;  %v594_v30 = vperm.slane %v586_v28, %v1981_v16 }
 0x163   : > { %v559_v25 = vrot.slane %v542_v17, 4  ;;  %v663_v27 = vrot.slane %v570_v22, 4  ;;  %v571_v31 = vrot.slane %v453_v20, 4  ;;  %v574_v32 = vsel %vm459_vm1, %v453_v20, %v573_v15 }
 0x164   : > { %v653_v33 = vrot.slane %v2021_v21, 4  ;;  %v590_v34 = vperm.slane %v584_v29, %v1981_v16  ;;  %v582_v35 = vperm.slane %v574_v32, %v1981_v16  ;;  %v556_v36 = vsel %vm459_vm1, %v555_v18, %v514_v55 }
 0x165   : > { %v664_v38 = vsel %vm459_vm1, %v663_v27, %v566_v14  ;;  %v607_v39 = vrot.slane %v594_v30, 4  ;;  %v572_v40 = vsel %vm459_vm1, %v571_v31, %v447_v43  ;;  %v560_v41 = vsel %vm459_vm1, %v559_v25, %v518_v49 }
 0x166   : > { %v595_v42 = vrot.slane %v590_v34, 4  ;;  %v578_v44 = vperm.slane %v572_v40, %v1981_v16  ;;  %v609_v45 = vrot.slane %v582_v35, 4  ;;  %v562_v46 = vsel %vm459_vm1, %v542_v17, %v561_v62 }
 0x167   : > { %v608_v47 = vsel %vm459_vm1, %v607_v39, %v582_v35  ;;  %v568_v48 = vsel %vm459_vm1, %v567_v26, %v530_v56  ;;  %v627_v50 = vrot.slane %v560_v41, 4  ;;  %v629_v51 = vrot.slane %v556_v36, 4 }
 0x168   : > { %v596_v52 = vsel %vm459_vm1, %v595_v42, %v578_v44  ;;  %v597_v53 = vrot.slane %v578_v44, 4  ;;  %v610_v54 = vsel %vm459_vm1, %v594_v30, %v609_v45  ;;  %v614_v43 = vperm.slane %v608_v47, %v1992_v37 }
 0x169   : > { %v2043_v49 = vperm.slane %v596_v52, %v1992_v37  ;;  %v618_v55 = vperm.slane %v610_v54, %v1992_v37  ;;  %v630_v57 = vsel %vm459_vm1, %v560_v41, %v629_v51  ;;  %v641_v58 = vrot.slane %v2018_v19, 4 }
 0x16a   : > { %v598_v56 = vsel %vm459_vm1, %v590_v34, %v597_v53  ;;  %v623_v59 = vrot.slane %v614_v43, 4  ;;  %v638_v60 = vperm.slane %v630_v57, %v1981_v16  ;;  %v639_v61 = vrot.slane %v562_v46, 4 }
 0x16b   : > { %v606_v62 = vperm.slane %v598_v56, %v1992_v37  ;;  %v625_v63 = vrot.slane %v618_v55, 4  ;;  %v642_v0 = vsel %vm459_vm1, %v562_v46, %v641_v58  ;;  %v651_v1 = vrot.slane %v568_v48, 4 }
 0x16c   : > { %v619_v2 = vrot.slane %v2043_v49, 4  ;;  %v650_v3 = vperm.slane %v642_v0, %v1981_v16  ;;  %v654_v5 = vsel %vm459_vm1, %v568_v48, %v653_v33  ;;  %v666_v6 = vsel %vm459_vm1, %v570_v22, %v665_v23 }
 0x16d   : > { %v621_v7 = vrot.slane %v606_v62, 4  ;;  %v626_v8 = vsel %vm459_vm1, 0.0, %v625_v63  ;;  %v750_v9 = vsel %vm459_vm1, %v625_v63, %v614_v43  ;;  %v662_v10 = vperm.slane %v654_v5, %v1981_v16 }
 0x16e   : > { %v2060_v11 = vperm.slane %v750_v9, %v1981_v16  ;;  %v755_v12 = vrot.slane %v626_v8, 4  ;;  %v674_v13 = vperm.slane %v666_v6, %v1981_v16  ;;  %v687_v14 = vrot.slane %v650_v3, 4 }
 0x16f   : > { %v689_v15 = vrot.slane %v638_v60, 4  ;;  %v713_v17 = vrot.slane %v662_v10, 4  ;;  %v628_v18 = vsel %vm459_vm1, %v627_v50, %v556_v36  ;;  %v640_v20 = vsel %vm459_vm1, %v639_v61, %v2018_v19 }
 0x170   : > { %v688_v22 = vsel %vm459_vm1, %v687_v14, %v638_v60  ;;  %v711_v23 = vrot.slane %v674_v13, 4  ;;  %v634_v24 = vperm.slane %v628_v18, %v1981_v16  ;;  %v646_v25 = vperm.slane %v640_v20, %v1981_v16 }
 0x171   : > { %v694_v26 = vperm.slane %v688_v22, %v1992_v37  ;;  %v690_v27 = vsel %vm459_vm1, %v650_v3, %v689_v15  ;;  %v714_v28 = vsel %vm459_vm1, %v674_v13, %v713_v17  ;;  %v652_v29 = vsel %vm459_vm1, %v651_v1, %v2021_v21 }
 0x172   : > { %v712_v30 = vsel %vm459_vm1, %v711_v23, %v662_v10  ;;  %v698_v19 = vperm.slane %v690_v27, %v1992_v37  ;;  %v722_v31 = vperm.slane %v714_v28, %v1992_v37  ;;  %v658_v32 = vperm.slane %v652_v29, %v1981_v16 }
 0x173   : > { %v718_v33 = vperm.slane %v712_v30, %v1992_v37  ;;  %v733_v34 = vrot.slane %v694_v26, 4  ;;  %v670_v35 = vperm.slane %v664_v38, %v1981_v16  ;;  %v675_v36 = vrot.slane %v646_v25, 4 }
 0x174   : > { %v735_v39 = vrot.slane %v722_v31, 4  ;;  %v737_v40 = vrot.slane %v698_v19, 4  ;;  %v677_v41 = vrot.slane %v634_v24, 4  ;;  %v701_v42 = vrot.slane %v658_v32, 4 }
 0x175   : > { %v731_v44 = vrot.slane %v718_v33, 4  ;;  %v734_v21 = vsel %vm459_vm1, %v718_v33, %v733_v34  ;;  %v676_v45 = vsel %vm459_vm1, %v675_v36, %v634_v24  ;;  %v699_v46 = vrot.slane %v670_v35, 4 }
 0x176   : > { %1428 = vmatpush.xpose.msk.msra.mxu2 %vm797_vm2, %v734_v21  ;;  %v736_v47 = vsel %vm459_vm1, %v735_v39, %v698_v19  ;;  %v682_v48 = vperm.slane %v676_v45, %v1992_v37  ;;  %v738_v50 = vsel %vm459_vm1, %v722_v31, %v737_v40  ;;  %v678_v38 = vsel %vm459_vm1, %v646_v25, %v677_v41 }
 0x177   : > { %v624_v51 = vsel %vm459_vm1, 0.0, %v623_v59  ;;  %v732_v52 = vsel %vm459_vm1, %v731_v44, %v694_v26  ;;  %1430 = vmatpush.xpose.msk.msra.mxu3 %vm797_vm2, %v736_v47  ;;  %v700_v53 = vsel %vm459_vm1, %v699_v46, %v658_v32  ;;  %v702_v54 = vsel %vm459_vm1, %v670_v35, %v701_v42  ;;  %v1535_v32 = vld [vmem:[%s343_s26] ss:$0 sm:$0xff] }
 0x178   : > { %1426 = vmatpush.xpose.msk.msra.mxu1 %vm797_vm2, %v732_v52  ;;  %v706_v43 = vperm.slane %v700_v53, %v1992_v37  ;;  %v725_v55 = vrot.slane %v682_v48, 4  ;;  %v686_v57 = vperm.slane %v678_v38, %v1992_v37  ;;  %v710_v58 = vperm.slane %v702_v54, %v1992_v37 }
 0x179   : > { %v622_v56 = vsel %vm459_vm1, 0.0, %v621_v7  ;;  %v739_v59 = vsel %vm459_vm1, %v621_v7, %v2043_v49  ;;  %v756_v60 = vsel %vm459_vm1, %v755_v12, %v624_v51  ;;  %v775_v61 = vrot.slane %v2060_v11, 4 }
 0x17a   : > { %v723_v62 = vrot.slane %v706_v43, 4  ;;  %v726_v63 = vsel %vm459_vm1, %v706_v43, %v725_v55  ;;  %v727_v0 = vrot.slane %v710_v58, 4  ;;  %v743_v1 = vperm.slane %v739_v59, %v1981_v16 }
 0x17b   : > { %1429 = vmatmul.msk.f32.vlgmr.msra.gmra.mxu2 %vm797_vm2, %v726_v63  ;;  %v744_v3 = vrot.slane %v622_v56, 4  ;;  %v760_v5 = vperm.slane %v756_v60, %v1981_v16  ;;  %v620_v7 = vsel %vm459_vm1, 0.0, %v619_v2  ;;  %v729_v17 = vrot.slane %v686_v57, 4 }
 0x17c   : > { %1432 = vmatpush.xpose.msk.msrb.mxu1 %vm797_vm2, %v738_v50  ;;  %v724_v6 = vsel %vm459_vm1, %v723_v62, %v682_v48  ;;  %v728_v8 = vsel %vm459_vm1, %v727_v0, %v686_v57  ;;  %v763_v9 = vrot.slane %v743_v1, 4 }
 0x17d   : > { %1427 = vmatmul.msk.f32.vlgmr.msra.gmra.mxu1 %vm797_vm2, %v724_v6  ;;  %1431 = vmatmul.msk.f32.vlgmr.msra.gmra.mxu3 %vm797_vm2, %v728_v8  ;;  %v745_v10 = vsel %vm459_vm1, %v744_v3, %v620_v7  ;;  %v776_v12 = vsel %vm459_vm1, %v760_v5, %v775_v61  ;;  %v773_v13 = vrot.slane %v760_v5, 4 }
 0x17e   : > { %v749_v14 = vperm.slane %v745_v10, %v1981_v16  ;;  %v784_v15 = vperm.slane %v776_v12, %v1992_v37 }
 0x17f   : > { %v774_v49 = vsel %vm459_vm1, %v773_v13, %v2060_v11  ;;  %v730_v11 = vsel %vm459_vm1, %v710_v58, %v729_v17 }
 0x180   : > { %v764_v2 = vsel %vm459_vm1, %v749_v14, %v763_v9  ;;  %v789_v18 = vrot.slane %v784_v15, 4  ;;  %v761_v20 = vrot.slane %v749_v14, 4  ;;  %v780_v22 = vperm.slane %v774_v49, %v1992_v37 }
 0x181   : > { %v772_v23 = vperm.slane %v764_v2, %v1992_v37 }
 0x182   : > { %v762_v24 = vsel %vm459_vm1, %v761_v20, %v743_v1  ;;  %v785_v25 = vrot.slane %v780_v22, 4 }
 0x183   : > { %v790_v26 = vsel %vm459_vm1, %v789_v18, %v772_v23  ;;  %v791_v27 = vrot.slane %v772_v23, 4  ;;  %v768_v28 = vperm.slane %v762_v24, %v1992_v37 }
 0x184   : > { %1002 = vmatpush.msrb.mxu0 %v790_v26 }
 0x185   : > { %1433 = vmatmul.msk.f32.vlgmr.msrb.gmra.mxu1 %vm797_vm2, %v730_v11  ;;  %v786_v29 = vsel %vm459_vm1, %v785_v25, %v768_v28  ;;  %v792_v30 = vsel %vm459_vm1, %v784_v15, %v791_v27  ;;  %v787_v19 = vrot.slane %v768_v28, 4 }
 0x186   : > { %956 = vmatpush.msrb.mxu2 %v786_v29  ;;  %1025 = vmatpush.msra.mxu1 %v792_v30 }
 0x187   : > { %v788_v31 = vsel %vm459_vm1, %v780_v22, %v787_v19 }
 0x188   : > { %979 = vmatpush.msrb.mxu3 %v788_v31 }
 0x1fa   : > { %v821_v33 = vpop.f32.mrf.mxu1 }
 0x1fb   : > { %v822_v34 = vadd.f32 %v1535_v32, %v821_v33 }
 0x1fd   : > { %v902_v35 = vsel %vm797_vm2, %v822_v34, -inf }
 0x1fe   : > { %903 = vmax.xlane.f32.xlu2 %v902_v35  ;;  %v847_v36 = vpop.f32.mrf.mxu2 }
 0x1ff   : > { %v848_v39 = vadd.f32 %v1535_v32, %v847_v36 }
 0x200   : > { %v873_v40 = vpop.f32.mrf.mxu3 }
 0x201   : > { %v874_v41 = vadd.f32 %v1535_v32, %v873_v40  ;;  %v905_v42 = vsel %vm797_vm2, %v848_v39, -inf }
 0x202   : > { %v899_v44 = vpop.f32.mrf.mxu1  ;;  %906 = vmax.xlane.f32.xlu0 %v905_v42 }
 0x203   : > { %v900_v21 = vadd.f32 %v1535_v32, %v899_v44  ;;  %v908_v45 = vsel %vm797_vm2, %v874_v41, -inf }
 0x204   : > { %909 = vmax.xlane.f32.xlu1 %v908_v45 }
 0x205   : > { %v911_v46 = vsel %vm797_vm2, %v900_v21, -inf }
 0x206   : > { %912 = vmax.xlane.f32.xlu2 %v911_v46 }
 0x271   : > { %v904_v47 = vpop.xlane.xlu2 %903 }
 0x272   : > { %v914_v48 = vsub.f32 %v822_v34, %v904_v47 }
 0x274   : > { %v918_v50 = vmul.f32 1.442695, %v914_v48 }
 0x275   : > { %v907_v38 = vpop.xlane.xlu0 %906 }
 0x276   : > { %1539 = vpow2.f32 %v918_v50  ;;  %v915_v51 = vsub.f32 %v848_v39, %v907_v38 }
 0x277   : > { %v910_v52 = vpop.xlane.xlu1 %909 }
 0x278   : > { %v916_v53 = vsub.f32 %v874_v41, %v910_v52  ;;  %v920_v54 = vmul.f32 1.442695, %v915_v51 }
 0x279   : > { %v913_v43 = vpop.xlane.xlu2 %912 }
 0x27a   : > { %v922_v55 = vmul.f32 1.442695, %v916_v53  ;;  %1541 = vpow2.f32 %v920_v54  ;;  %v917_v57 = vsub.f32 %v900_v21, %v913_v43 }
 0x27c   : > { %v1540_v58 = vpop.eup %1539  ;;  %1543 = vpow2.f32 %v922_v55  ;;  %v924_v56 = vmul.f32 1.442695, %v917_v57 }
 0x27d   : > { %1434 = vmatmul.msk.f32.vlgmr.msrb.gmra.mxu2 %vm797_vm2, %v1540_v58  ;;  %v926_v59 = vsel %vm797_vm2, %v1540_v58, 0.0 }
 0x27e   : > { %1545 = vpow2.f32 %v924_v56  ;;  %927 = vadd.xlane.f32.xlu0 %v926_v59 }
 0x280   : > { %v1542_v60 = vpop.eup %1541 }
 0x281   : > { %1435 = vmatmul.msk.f32.vlgmr.msrb.gmra.mxu3 %vm797_vm2, %v1542_v60  ;;  %v929_v1 = vsel %vm797_vm2, %v1542_v60, 0.0 }
 0x282   : > { %v1544_v61 = vpop.eup %1543 }
 0x283   : > { %1436 = vmatmul.msk.f32.vlgmr.msrb.gmra.mxu0 %vm797_vm2, %v1544_v61  ;;  %v932_v62 = vsel %vm797_vm2, %v1544_v61, 0.0 }
 0x284   : > { %v1546_v63 = vpop.eup %1545  ;;  %933 = vadd.xlane.f32.xlu2 %v932_v62 }
 0x285   : > { %1437 = vmatmul.msk.f32.vlgmr.msra.gmra.mxu1 %vm797_vm2, %v1546_v63  ;;  %v935_v0 = vsel %vm797_vm2, %v1546_v63, 0.0 }
 0x286   : > { %936 = vadd.xlane.f32.xlu1 %v935_v0 }
 0x28c   : > { %930 = vadd.xlane.f32.xlu2 %v929_v1 }
 0x2f1   : > { %v928_v3 = vpop.xlane.xlu0 %927 }
 0x2f2   : > { %1547 = vrcp.f32 %v928_v3  ;;  %v1039_v49 = vand.u32 2147483647, %v928_v3  ;;  %v1041_v2 = vand.u32 2147483648, %v928_v3  ;;  %vm1035_vm4 = vweird.f32 %v928_v3 }
 0x2f4   : > { %vm1040_vm7 = vcmp.eq.f32.partialorder %v1039_v49, 8.507059e+37  ;;  %v1042_v28 = vor.u32 1.1754944e-38, %v1041_v2 }
 0x2f7   : > { %v934_v5 = vpop.xlane.xlu2 %933 }
 0x2f8   : > { %v1548_v6 = vpop.eup %1547  ;;  %1549 = vrcp.f32 %v934_v5  ;;  %v1067_v23 = vand.u32 2147483647, %v934_v5  ;;  %v1069_v24 = vand.u32 2147483648, %v934_v5  ;;  %vm1063_vm8 = vweird.f32 %v934_v5 }
 0x2f9   : > { %v1031_v8 = vmul.f32 %v1548_v6, %v928_v3  ;;  %v937_v7 = vpop.xlane.xlu1 %936  ;;  %vm1036_vm3 = vweird.f32 %v1548_v6 }
 0x2fa   : > { %1551 = vrcp.f32 %v937_v7  ;;  %vm2144_vm5 = vmor %vm1035_vm4, %vm1036_vm3  ;;  %v1081_v11 = vand.u32 2147483647, %v937_v7  ;;  %v1083_v29 = vand.u32 2147483648, %v937_v7  ;;  %vm1068_vm11 = vcmp.eq.f32.partialorder %v1067_v23, 8.507059e+37 }
 0x2fb   : > { %v1032_v9 = vsub.f32 1.0, %v1031_v8  ;;  %v1070_v33 = vor.u32 1.1754944e-38, %v1069_v24  ;;  %vm1077_vm12 = vweird.f32 %v937_v7 }
 0x2fc   : > { %vm1082_vm14 = vcmp.eq.f32.partialorder %v1081_v11, 8.507059e+37  ;;  %v1084_v42 = vor.u32 1.1754944e-38, %v1083_v29 }
 0x2fd   : > { %v1033_v10 = vmul.f32 %v1548_v6, %v1032_v9 }
 0x2fe   : > { %v1550_v12 = vpop.eup %1549 }
 0x2ff   : > { %v1059_v13 = vmul.f32 %v1550_v12, %v934_v5  ;;  %v1034_v14 = vadd.f32 %v1548_v6, %v1033_v10  ;;  %v931_v15 = vpop.xlane.xlu2 %930  ;;  %vm1064_vm6 = vweird.f32 %v1550_v12 }
 0x300   : > { %v1552_v17 = vpop.eup %1551  ;;  %1553 = vrcp.f32 %v931_v15  ;;  %vm1065_vm10 = vmor %vm1063_vm8, %vm1064_vm6  ;;  %v958_v39 = vpop.f32.mrf.mxu2  ;;  %v1055_v48 = vand.u32 2147483648, %v931_v15  ;;  %v1053_v51 = vand.u32 2147483647, %v931_v15  ;;  %vm1049_vm3 = vweird.f32 %v931_v15 }
 0x301   : > { %v1073_v18 = vmul.f32 %v1552_v17, %v937_v7  ;;  %v1060_v20 = vsub.f32 1.0, %v1059_v13  ;;  %v1038_v26 = vsel %vm2144_vm5, %v1548_v6, %v1034_v14  ;;  %vm1078_vm9 = vweird.f32 %v1552_v17  ;;  %v1004_v40 = vpop.f32.mrf.mxu0 }
 0x302   : > { %v1043_v32 = vsel %vm1040_vm7, %v1042_v28, %v1038_v26  ;;  %vm1079_vm13 = vmor %vm1077_vm12, %vm1078_vm9  ;;  %v1027_v52 = vpop.f32.mrf.mxu1  ;;  %v1056_v57 = vor.u32 1.1754944e-38, %v1055_v48  ;;  %vm1054_vm5 = vcmp.eq.f32.partialorder %v1053_v51, 8.507059e+37  ;;  %vm1213_vm6 = vcmask 130048  }
 0x303   : > { %v1074_v25 = vsub.f32 1.0, %v1073_v18  ;;  %v1061_v27 = vmul.f32 %v1550_v12, %v1060_v20  ;;  %v1086_v44 = vmul.f32 %v1043_v32, %v958_v39  ;;  %vm1215_vm7 = vcmask 195584  }
 0x304   : > { %v981_v60 = vpop.f32.mrf.mxu3 }
 0x305   : > { %v1062_v30 = vadd.f32 %v1550_v12, %v1061_v27  ;;  %v1075_v19 = vmul.f32 %v1552_v17, %v1074_v25  ;;  %v1092_v53 = vrot.slane %v1086_v44, 4 }
 0x306   : > { %v1554_v31 = vpop.eup %1553 }
 0x307   : > { %v1045_v34 = vmul.f32 %v1554_v31, %v931_v15  ;;  %v1066_v35 = vsel %vm1065_vm10, %v1550_v12, %v1062_v30  ;;  %v1076_v36 = vadd.f32 %v1552_v17, %v1075_v19  ;;  %vm1050_vm15 = vweird.f32 %v1554_v31 }
 0x308   : > { %v1071_v41 = vsel %vm1068_vm11, %v1070_v33, %v1066_v35  ;;  %vm1051_vm4 = vmor %vm1049_vm3, %vm1050_vm15 }
 0x309   : > { %v1046_v21 = vsub.f32 1.0, %v1045_v34  ;;  %v1088_v45 = vmul.f32 %v1071_v41, %v1004_v40  ;;  %v1080_v46 = vsel %vm1079_vm13, %v1552_v17, %v1076_v36 }
 0x30a   : > { %v1085_v47 = vsel %vm1082_vm14, %v1084_v42, %v1080_v46 }
 0x30b   : > { %v1090_v50 = vrot.slane %v1088_v45, 4  ;;  %v1047_v38 = vmul.f32 %v1554_v31, %v1046_v21  ;;  %v1089_v43 = vmul.f32 %v1085_v47, %v1027_v52  ;;  %v1093_v58 = vsel %vm459_vm1, %v1088_v45, %v1092_v53 }
 0x30c   : > { %v1101_v0 = vperm.slane %v1093_v58, %v1981_v16 }
 0x30d   : > { %v1091_v54 = vsel %vm459_vm1, %v1090_v50, %v1086_v44  ;;  %v1048_v55 = vadd.f32 %v1554_v31, %v1047_v38  ;;  %v1102_v62 = vrot.slane %v1089_v43, 4 }
 0x30e   : > { %v1097_v59 = vperm.slane %v1091_v54, %v1981_v16  ;;  %v1128_v7 = vrot.slane %v1101_v0, 4 }
 0x30f   : > { %v1052_v56 = vsel %vm1051_vm4, %v1554_v31, %v1048_v55 }
 0x310   : > { %v1057_v61 = vsel %vm1054_vm5, %v1056_v57, %v1052_v56  ;;  %v1116_v5 = vrot.slane %v1097_v59, 4  ;;  %v1220_v56 = vld [vmem:[#allocation8 + $0x18] sm:$0xff] }
 0x311   : > { %v1087_v63 = vmul.f32 %v1057_v61, %v981_v60  ;;  %1240 = vmatpush.msra.mxu2 %v1220_v56  ;;  %v1218_v60 = vld [vmem:[#allocation8 + $0x8] sm:$0xff] }
 0x313   : > { %v1103_v1 = vsel %vm459_vm1, %v1102_v62, %v1087_v63  ;;  %v1104_v3 = vrot.slane %v1087_v63, 4 }
 0x314   : > { %v1109_v6 = vperm.slane %v1103_v1, %v1981_v16 }
 0x315   : > { %v1105_v8 = vsel %vm459_vm1, %v1089_v43, %v1104_v3 }
 0x316   : > { %v1113_v9 = vperm.slane %v1105_v8, %v1981_v16  ;;  %v1114_v10 = vrot.slane %v1109_v6, 4  ;;  %v1117_v12 = vsel %vm459_vm1, %v1109_v6, %v1116_v5  ;;  %v1536_v5 = vld [vmem:[%s2245_s5] ss:$0 sm:$0xff] }
 0x317   : > { %v1125_v13 = vperm.slane %v1117_v12, %v1992_v37 }
 0x318   : > { %v1115_v14 = vsel %vm459_vm1, %v1114_v10, %v1097_v59  ;;  %v1126_v15 = vrot.slane %v1113_v9, 4  ;;  %v1129_v17 = vsel %vm459_vm1, %v1113_v9, %v1128_v7  ;;  %v1219_v59 = vld [vmem:[#allocation8 + $0x10] sm:$0xff]  ;;  %v1779_v10 = vmov 32.0  }
 0x319   : > { %v1121_v49 = vperm.slane %v1115_v14, %v1992_v37  ;;  %v1137_v2 = vperm.slane %v1129_v17, %v1992_v37  ;;  %v1140_v18 = vrot.slane %v1125_v13, 4  ;;  %1241 = vmatpush.msra.mxu2 %v1219_v59  ;;  %1555 = vrcp.f32 %v1779_v10 }
 0x31a   : > { %v1127_v20 = vsel %vm459_vm1, %v1126_v15, %v1101_v0 }
 0x31b   : > { %v1133_v22 = vperm.slane %v1127_v20, %v1992_v37  ;;  %v1138_v23 = vrot.slane %v1121_v49, 4  ;;  %v1141_v24 = vsel %vm459_vm1, 0.0, %v1140_v18  ;;  %v1144_v25 = vrot.slane %v1137_v2, 4  ;;  %1242 = vmatpush.msra.mxu2 %v1218_v60 }
 0x31c   : > { %v1146_v26 = vsel %vm459_vm1, %v1140_v18, %v1121_v49  ;;  %v1151_v27 = vrot.slane %v1141_v24, 4 }
 0x31d   : > { %v1145_v28 = vsel %vm459_vm1, 0.0, %v1144_v25  ;;  %v1139_v11 = vsel %vm459_vm1, 0.0, %v1138_v23  ;;  %v1142_v29 = vrot.slane %v1133_v22, 4  ;;  %v1150_v30 = vperm.slane %v1146_v26, %v1981_v16 }
 0x31e   : > { %v1162_v19 = vrot.slane %v1145_v28, 4  ;;  %v1152_v31 = vsel %vm459_vm1, %v1151_v27, %v1139_v11  ;;  %v1157_v32 = vsel %vm459_vm1, %v1144_v25, %v1133_v22 }
 0x31f   : > { %v1143_v33 = vsel %vm459_vm1, 0.0, %v1142_v29  ;;  %v1156_v34 = vperm.slane %v1152_v31, %v1981_v16  ;;  %v1161_v35 = vperm.slane %v1157_v32, %v1981_v16  ;;  %v1170_v36 = vrot.slane %v1150_v30, 4  ;;  %v1556_v12 = vpop.eup %1555 }
 0x320   : > { %v1163_v39 = vsel %vm459_vm1, %v1162_v19, %v1143_v33  ;;  %v1253_v13 = vmul.f32 32.0, %v1556_v12  ;;  %v1537_v19 = vld [vmem:[%s2246_s6] ss:$0 sm:$0xff] }
 0x321   : > { %v1167_v40 = vperm.slane %v1163_v39, %v1981_v16  ;;  %v1171_v41 = vsel %vm459_vm1, %v1156_v34, %v1170_v36  ;;  %v1182_v42 = vrot.slane %v1161_v35, 4  ;;  %v1168_v44 = vrot.slane %v1156_v34, 4  ;;  %v1538_v33 = vld [vmem:[%s2247_s7] ss:$0 sm:$0xff] }
 0x322   : > { %v1179_v21 = vperm.slane %v1171_v41, %v1992_v37  ;;  %v1254_v14 = vsub.f32 1.0, %v1253_v13 }
 0x323   : > { %v1183_v45 = vsel %vm459_vm1, %v1167_v40, %v1182_v42  ;;  %v1169_v46 = vsel %vm459_vm1, %v1168_v44, %v1150_v30  ;;  %v1180_v47 = vrot.slane %v1167_v40, 4 }
 0x324   : > { %v1191_v48 = vperm.slane %v1183_v45, %v1992_v37  ;;  %v1198_v50 = vrot.slane %v1179_v21, 4  ;;  %v1175_v38 = vperm.slane %v1169_v46, %v1992_v37  ;;  %v1255_v15 = vmul.f32 %v1556_v12, %v1254_v14 }
 0x325   : > { %v1181_v51 = vsel %vm459_vm1, %v1180_v47, %v1161_v35 }
 0x326   : > { %v1199_v16 = vsel %vm459_vm1, %v1191_v48, %v1198_v50  ;;  %v1196_v52 = vrot.slane %v1191_v48, 4  ;;  %v1187_v53 = vperm.slane %v1181_v51, %v1992_v37  ;;  %v1194_v54 = vrot.slane %v1175_v38, 4  ;;  %v1217_v37 = vld [vmem:[#allocation8] sm:$0xff] }
 0x327   : > { %1209 = vrot.lane.b32.xlu2 %v1199_v16, %s1776_s21  ;;  %1243 = vmatpush.msra.mxu2 %v1217_v37  ;;  %v1256_v17 = vadd.f32 %v1556_v12, %v1255_v15  ;;  %s1695_s21 = scalar_lea.hbm %s1694_s14, 8 }
 0x328   : > { %v1197_v43 = vsel %vm459_vm1, %v1196_v52, %v1179_v21  ;;  %v1192_v55 = vrot.slane %v1187_v53, 4  ;;  %v1195_v57 = vsel %vm459_vm1, %v1187_v53, %v1194_v54  ;;  %p1696_p1 = scmp.ne.s32.totalorder %s1694_s14, %s1695_s21  ;;  %p1701_p9 = scmp.lt.s32.totalorder %s1699_s24, %s1695_s21 }
 0x329   : > { %1205 = vrot.lane.b32.xlu1 %v1197_v43, %s1777_s13  ;;  %1201 = vrot.lane.b32.xlu0 %v1195_v57, %s1778_s16 }
 0x32a   : > { %v1193_v58 = vsel %vm459_vm1, %v1192_v55, %v1175_v38  ;;  %vm1257_vm1 = vweird.f32 %v1556_v12  ;;  %p1697_p3 = pnand %p1696_p1, %p1896_p4  ;;  %p1702_p5 = por %p1701_p9, %p1700_p7 }
 0x32b   : > { %v1258_v49 = vsel %vm1257_vm1, %v1556_v12, %v1256_v17 }
 0x32c   : > { %p1698_p12 = pneg %p1697_p3 }
 0x32e   : > { %p1703_p8 = pnand %p1702_p5, %p1698_p12 }
 0x381   : > { %v1210_v0 = vpop.permute.xlu2 %1209 }
 0x39b   : > { %v1206_v61 = vpop.permute.xlu1 %1205  ;;  %v1202_v62 = vpop.permute.xlu0 %1201 }
 0x39c   : > { %v1212_v63 = vsel %vm797_vm2, %v1193_v58, %v1202_v62 }
 0x39d   : > { %v1214_v1 = vsel %vm1213_vm6, %v1212_v63, %v1206_v61 }
 0x39e   : > { %v1216_v3 = vsel %vm1215_vm7, %v1214_v1, %v1210_v0 }
 0x39f   : > { %1438 = vmatmul.msk.f32.vlgmr.msra.gmra.mxu2 %vm400_vm0, %v1216_v3 }
 0x422   : > { %v1245_v6 = vpop.f32.mrf.mxu2 }
 0x423   : > { %v1246_v8 = vadd.f32 %v1536_v5, %v1245_v6 }
 0x425   : > { %v1248_v7 = vadd.f32 %v1246_v8, %v1973_v4 }
 0x427   : > { %v1249_v9 = vsel %vm400_vm0, %v1248_v7, 0.0 }
 0x428   : > { %1250 = vadd.xlane.f32.xlu0 %v1249_v9 }
 0x49b   : > { %v1251_v2 = vpop.xlane.xlu0 %1250 }
 0x49c   : > { %v1259_v18 = vmul.f32 %v1258_v49, %v1251_v2 }
 0x49e   : > { %v1260_v20 = vsub.f32 %v1248_v7, %v1259_v18 }
 0x4a0   : > { %v1261_v22 = vmul.f32 %v1260_v20, %v1260_v20 }
 0x4a2   : > { %v1262_v23 = vsel %vm400_vm0, %v1261_v22, 0.0 }
 0x4a3   : > { %1263 = vadd.xlane.f32.xlu1 %v1262_v23 }
 0x516   : > { %v1264_v4 = vpop.xlane.xlu1 %1263 }
 0x517   : > { %v1265_v24 = vmul.f32 %v1264_v4, %v1258_v49 }
 0x519   : > { %v1266_v25 = vadd.f32 1e-12, %v1265_v24 }
 0x51b   : > { %1557 = vrsqrt.f32 %v1266_v25  ;;  %vm1273_vm8 = vweird.f32 %v1266_v25 }
 0x521   : > { %v1558_v26 = vpop.eup %1557 }
 0x522   : > { %v1268_v27 = vmul.f32 %v1558_v26, %v1266_v25  ;;  %vm1274_vm2 = vweird.f32 %v1558_v26 }
 0x523   : > { %vm1275_vm9 = vmor %vm1273_vm8, %vm1274_vm2 }
 0x524   : > { %v1269_v28 = vmul.f32 %v1558_v26, %v1268_v27 }
 0x526   : > { %v1270_v11 = vmul.f32 0.5, %v1269_v28 }
 0x528   : > { %v1271_v29 = vsub.f32 1.5, %v1270_v11 }
 0x52a   : > { %v1272_v30 = vmul.f32 %v1558_v26, %v1271_v29 }
 0x52c   : > { %v1276_v31 = vsel %vm1275_vm9, %v1558_v26, %v1272_v30 }
 0x52d   : > { %v1278_v32 = vmul.f32 %v1276_v31, %v1260_v20 }
 0x52f   : > { %v1282_v34 = vmul.f32 %v1537_v19, %v1278_v32 }
 0x531   : > { %v1287_v35 = vadd.f32 %v1538_v33, %v1282_v34 }
 0x533   : > { %1288 = vst.msk [vmem:[%s390_s12] sm:$0xff] %vm400_vm0, %v1287_v35 }
 0x534   : > { %1706 = shalt.err (!%p1703_p8)
}
 0x535   : > { %1455 = dma.vmem_to_hbm [thread:$0]  (%p1896_p4), %s1303_s23, 128, %s1305_s25, %s1290_s20  }
 0x536 PF: > { %s1316_s22 = sand.u32 1, %s1745_s27   ;;  %p2270_p10 = scmp.ge.s32.totalorder %s1757_s30, 2 }
 0x537   : > { %s1317_s17 = scalar_lea.sflag [#allocation4], %s1316_s22 }
 0x538   : > { %p1472_p13 = pnand %p2270_p10, %p1900_p6 }
 0x53a   : > { %p1473_p11 = pneg %p1472_p13 }
 0x53c   : > { %1740 = dma.done.wait (%p1473_p11), %s1317_s17, 128  }
 0x53d   : > { %1742 = vsyncadd (%p1473_p11), %s1317_s17, 4294967168  ;;  %s2271_s30 = sld [smem:[#allocation17_spill]]  ;;  %s2274_s27 = smov %s1749_s28 }
 0x53e   : > { %s2272_s10 = sld [smem:[#allocation16_spill]] }
 0x53f   : > { %s2273_s29 = sld [smem:[#allocation18_spill]] }
 0x543   : > { %p25_p0 = scmp.ge.s32.totalorder %s2271_s30, 4  }
 0x544   : > { %s2275_s28 = smov %s2272_s10 }
 0x545   :  { %27 = sbr.rel (!%p25_p0) target bundleno = 11 (0xb), region = 118 }
 0x54a   :  { %1323 = vsyncpa [#allocation3], 1 }
 0x54b   :  { %1325 = vsyncpa [#allocation3 + $0x1], 1 }
 0x54c   :  { %1326 = vsyncpa [#allocation6], 1 }
 0x54d   :  { %1328 = vsyncpa [#allocation6 + $0x1], 1 }
 0x54e   :  { %1329 = vsyncpa [#allocation9], 1 }
 0x54f   :  { %1330 = vsyncpa [#allocation4], 1 }
 0x550   :  { %1332 = vsyncpa [#allocation4 + $0x1], 1 }

</bundles_post_ra>
